<compile_context>
chip_gen: v7x
topology: tpu7x:2x2x1
jax: 0.10.0
libtpu: 0.0.40
codegen_flags: <defaults>
</compile_context>

<pallas_src>
import functools
import math

import jax
import jax.numpy as jnp
from jax.experimental import pallas as pl
from jax.experimental.pallas import tpu as pltpu

EPS = 1e-5


# --------------------------------------------------------------------------- #
# In-kernel helpers
# --------------------------------------------------------------------------- #
def _conv3x3_rows(x, bw_ref, bias, H):
    """3x3 SAME conv of a stack of N images in lane-dense (N*H, W*Cin) layout.

    bw_ref: (3*W*Cin, W*Cout) K-concatenated banded block-Toeplitz weights in
    tap order [h-1 | h | h+1]; horizontal (W) zero padding is encoded in the
    zero blocks, vertical (H) padding is the roll + per-image row mask below.
    One MXU matmul (f32 accumulation); operands cast to bw_ref.dtype.
    """
    nh = x.shape[0]
    row = jax.lax.broadcasted_iota(jnp.int32, x.shape, 0)
    up = jnp.where(row % H == 0, 0.0, pltpu.roll(x, shift=1, axis=0))        # h-1
    down = jnp.where(row % H == H - 1, 0.0, pltpu.roll(x, shift=nh - 1, axis=0))  # h+1
    lhs = jnp.concatenate([up, x, down], axis=1).astype(bw_ref.dtype)        # (NH, 3*WCin)
    y = jnp.dot(lhs, bw_ref[...], preferred_element_type=jnp.float32)
    return y + bias                                   # bias pre-tiled to (1, WCout)


def _bn_fold(y, gamma, beta, red, inv_count):
    """Training-mode BatchNorm folded into per-lane scale/shift, all f32.

    red: (WC, WC) 0/1 matrix with red[i,j] = (i%C == j%C); one small MXU matmul
    turns per-lane sums into per-channel sums already broadcast back to the
    (1, W*C) lane layout (no sub-128-lane reshapes, nothing leaves VMEM).
    """
    s = jnp.sum(y, axis=0, keepdims=True)                       # (1, WC)
    sq = jnp.sum(y * y, axis=0, keepdims=True)                  # (1, WC)
    cs = jnp.dot(s, red, preferred_element_type=jnp.float32)    # per-channel sum
    csq = jnp.dot(sq, red, preferred_element_type=jnp.float32)  # per-channel sumsq
    mean = cs * inv_count
    var = csq * inv_count - mean * mean        # biased variance (training-mode BN)
    scale = gamma * jax.lax.rsqrt(var + EPS)
    shift = beta - mean * scale
    return scale, shift


# --------------------------------------------------------------------------- #
# The single fused kernel
# --------------------------------------------------------------------------- #
def _conv_block_kernel(x_ref, bw1_ref, b1_ref, bw2_ref, b2_ref,
                       gamma_ref, beta_ref, red_ref, out_ref, *, H, inv_count):
    x = x_ref[...]                                            # (N*H, W*Cin) f32
    red = red_ref[...]
    gamma = gamma_ref[...]
    beta = beta_ref[...]

    # conv1 + bias, BN1 (batch stats), ReLU
    y1 = _conv3x3_rows(x, bw1_ref, b1_ref[...], H)            # (N*H, W*Cout) f32
    sc1, sh1 = _bn_fold(y1, gamma, beta, red, inv_count)
    x1r = jnp.maximum(y1 * sc1 + sh1, 0.0)                    # ReLU(BN1(conv1(x)))

    # conv2 + bias, BN2 (fresh batch stats, shared gamma/beta)
    y2 = _conv3x3_rows(x1r, bw2_ref, b2_ref[...], H)
    sc2, sh2 = _bn_fold(y2, gamma, beta, red, inv_count)

    # residual add (inplace-ReLU aliasing => residual is x1r) + final ReLU
    out_ref[...] = jnp.maximum(x1r + y2 * sc2 + sh2, 0.0)


# --------------------------------------------------------------------------- #
# Host-side (one-time, parameter-sized) preparation
# --------------------------------------------------------------------------- #
def _pad_in_channels(cin, w):
    """Smallest cin' >= cin with (w * cin') % 128 == 0 (full-width vregs)."""
    step = 128 // math.gcd(w, 128)
    return -(-cin // step) * step


def _build_banded_weights(w_hwio, W):
    """(3,3,Cin,Cout) HWIO -> (3*W*Cin, W*Cout) K-concatenated banded matrix.

    BW[dh*W*Cin + wi*Cin + ci, wo*Cout + co] = w[dh, wi-wo+1, ci, co] if
    |wi-wo| <= 1 else 0 (SAME horizontal padding lives in the zero blocks).
    """
    Cin, Cout = w_hwio.shape[2], w_hwio.shape[3]
    dw = jnp.arange(3)[:, None, None]
    wi = jnp.arange(W)[None, :, None]
    wo = jnp.arange(W)[None, None, :]
    sel = (wi == wo + dw - 1).astype(w_hwio.dtype)            # (3, W, W)
    bw = jnp.einsum("dxy,hdio->hxiyo", sel, w_hwio)           # (3, W, Cin, W, Cout)
    return bw.reshape(3 * W * Cin, W * Cout)


# --------------------------------------------------------------------------- #
# Forward
# --------------------------------------------------------------------------- #
def conv_block_forward(x_nchw, w1_oihw, b1, w2_oihw, b2, gamma, beta,
                       matmul_dtype=jnp.bfloat16):
    """x: (N,Cin,H,W) f32 (PyTorch NCHW); w*: (Cout,Cin,3,3) OIHW; out: NCHW."""
    N, Cin, H, W = x_nchw.shape
    Cout = w1_oihw.shape[0]
    Cinp = _pad_in_channels(Cin, W)          # zero-pad Cin so W*Cin is lane-aligned
    WCin, WCout = W * Cinp, W * Cout

    # NCHW -> lane-dense (N*H, W*Cin_pad) row slabs (padded channels are zero).
    x = jnp.transpose(x_nchw, (0, 2, 3, 1))
    if Cinp != Cin:
        x = jnp.pad(x, ((0, 0), (0, 0), (0, 0), (0, Cinp - Cin)))
    x = x.reshape(N * H, WCin)

    # OIHW -> HWIO, pad conv1 Cin with zero rows, build banded weights.
    w1 = jnp.transpose(w1_oihw, (2, 3, 1, 0))
    w2 = jnp.transpose(w2_oihw, (2, 3, 1, 0))
    if Cinp != Cin:
        w1 = jnp.pad(w1, ((0, 0), (0, 0), (0, Cinp - Cin), (0, 0)))
    bw1 = _build_banded_weights(w1, W).astype(matmul_dtype)   # (3*WCin,  WCout)
    bw2 = _build_banded_weights(w2, W).astype(matmul_dtype)   # (3*WCout, WCout)

    # Per-lane (W-tiled) bias / gamma / beta vectors.
    b1t = jnp.tile(b1, W).reshape(1, WCout)
    b2t = jnp.tile(b2, W).reshape(1, WCout)
    gt = jnp.tile(gamma, W).reshape(1, WCout)
    bt = jnp.tile(beta, W).reshape(1, WCout)

    # Channel-group reduction matrix: red[i, j] = (i % Cout == j % Cout).
    lane = jnp.arange(WCout)
    red = (lane[:, None] % Cout == lane[None, :] % Cout).astype(jnp.float32)

    kernel = functools.partial(_conv_block_kernel, H=H,
                               inv_count=1.0 / float(N * H * W))

    # Single gridless pallas_call: every operand is one full VMEM block
    # (total working set well under 1 MiB at this shape).
    out = pl.pallas_call(
        kernel,
        out_shape=jax.ShapeDtypeStruct((N * H, WCout), jnp.float32),
    )(x, bw1, b1t, bw2, b2t, gt, bt, red)

    return jnp.transpose(out.reshape(N, H, W, Cout), (0, 3, 1, 2))   # back to NCHW


# --------------------------------------------------------------------------- #
# Pure-JAX reference (NCHW / OIHW), faithful to nn.ReLU(inplace=True) aliasing
# --------------------------------------------------------------------------- #
def conv_block_reference(x_nchw, w1_oihw, b1, w2_oihw, b2, gamma, beta):
    def conv(y, w, b):
        out = jax.lax.conv_general_dilated(
            y, w, window_strides=(1, 1), padding="SAME",
            dimension_numbers=("NCHW", "OIHW", "NCHW"))
        return out + b[None, :, None, None]

    def bn(y):
        m = jnp.mean(y, axis=(0, 2, 3), keepdims=True)
        v = jnp.mean((y - m) ** 2, axis=(0, 2, 3), keepdims=True)
        return ((y - m) * jax.lax.rsqrt(v + EPS) * gamma[None, :, None, None]
                + beta[None, :, None, None])

    x1 = bn(conv(x_nchw, w1_oihw, b1))
    x1r = jnp.maximum(x1, 0.0)          # inplace ReLU also rewrites x_1
    x2 = bn(conv(x1r, w2_oihw, b2))
    return jnp.maximum(x1r + x2, 0.0)


if __name__ == "__main__":
    N, H, W = 2, 16, 16
    in_ch, out_ch = 4, 8
    dropout = 0.0   # conv_block(in_ch=4, out_ch=8, dropout=0.0): Dropout2d no-op

    key = jax.random.PRNGKey(0)
    kx, kw1, kb1, kw2, kb2 = jax.random.split(key, 5)

    x = jax.random.normal(kx, (N, in_ch, H, W), jnp.float32)                # NCHW
    # Synthetic parameters with nn.Conv2d / nn.BatchNorm2d-compatible shapes
    w1 = jax.random.normal(kw1, (out_ch, in_ch, 3, 3), jnp.float32) * 0.1    # OIHW
    b1 = jax.random.normal(kb1, (out_ch,), jnp.float32) * 0.1
    w2 = jax.random.normal(kw2, (out_ch, out_ch, 3, 3), jnp.float32) * 0.1
    b2 = jax.random.normal(kb2, (out_ch,), jnp.float32) * 0.1
    gamma = jnp.ones((out_ch,), jnp.float32)    # BatchNorm2d default weight
    beta = jnp.zeros((out_ch,), jnp.float32)    # BatchNorm2d default bias

    ref = conv_block_reference(x, w1, b1, w2, b2, gamma, beta)

    # f32 MXU-operand path: tight match against the reference.
    out_f32 = jax.block_until_ready(
        conv_block_forward(x, w1, b1, w2, b2, gamma, beta,
                           matmul_dtype=jnp.float32))
    assert out_f32.shape == (N, out_ch, H, W)
    err_f32 = float(jnp.max(jnp.abs(out_f32 - ref)))
    assert jnp.allclose(out_f32, ref, atol=2e-3, rtol=2e-3), (
        f"f32 max abs err = {err_f32}")

    # bf16 MXU-operand path (default: native MXU rate on v6e/v7x, half operand
    # bytes on v5e); BN / elementwise math stays f32.  Looser bf16 tolerance.
    out_bf16 = jax.block_until_ready(
        conv_block_forward(x, w1, b1, w2, b2, gamma, beta))
    err_bf16 = float(jnp.max(jnp.abs(out_bf16 - ref)))
    assert jnp.allclose(out_bf16, ref, atol=5e-2, rtol=5e-2), (
        f"bf16 max abs err = {err_bf16}")

    print("KERNEL_OK")
</pallas_src>

<mosaic_0001>
module attributes {stable_mosaic.version = 11 : i64} {
  func.func @_conv_block_kernel(%arg0: memref<32x128xf32, #tpu.memory_space<vmem>>, %arg1: memref<384x128xf32, #tpu.memory_space<vmem>>, %arg2: memref<1x128xf32, #tpu.memory_space<vmem>>, %arg3: memref<384x128xf32, #tpu.memory_space<vmem>>, %arg4: memref<1x128xf32, #tpu.memory_space<vmem>>, %arg5: memref<1x128xf32, #tpu.memory_space<vmem>>, %arg6: memref<1x128xf32, #tpu.memory_space<vmem>>, %arg7: memref<128x128xf32, #tpu.memory_space<vmem>>, %arg8: memref<32x128xf32, #tpu.memory_space<vmem>>) attributes {dimension_semantics = [], scalar_prefetch = 0 : i64, scratch_operands = 0 : i64, tpu.core_type = #tpu.core_type<tc>} {
    %c0 = arith.constant 0 : index
    %c0_0 = arith.constant 0 : index
    %0 = vector.load %arg0[%c0, %c0_0] : memref<32x128xf32, #tpu.memory_space<vmem>>, vector<32x128xf32>
    %c0_1 = arith.constant 0 : index
    %c0_2 = arith.constant 0 : index
    %1 = vector.load %arg7[%c0_1, %c0_2] : memref<128x128xf32, #tpu.memory_space<vmem>>, vector<128x128xf32>
    %c0_3 = arith.constant 0 : index
    %c0_4 = arith.constant 0 : index
    %2 = vector.load %arg5[%c0_3, %c0_4] : memref<1x128xf32, #tpu.memory_space<vmem>>, vector<1x128xf32>
    %c0_5 = arith.constant 0 : index
    %c0_6 = arith.constant 0 : index
    %3 = vector.load %arg6[%c0_5, %c0_6] : memref<1x128xf32, #tpu.memory_space<vmem>>, vector<1x128xf32>
    %c0_7 = arith.constant 0 : index
    %c0_8 = arith.constant 0 : index
    %4 = vector.load %arg2[%c0_7, %c0_8] : memref<1x128xf32, #tpu.memory_space<vmem>>, vector<1x128xf32>
    %5 = tpu.iota {dimensions = array<i32: 0>} : vector<32x128xi32>
    %c16_i32 = arith.constant 16 : i32
    %c0_i32 = arith.constant 0 : i32
    %6 = arith.cmpi eq, %c16_i32, %c0_i32 : i32
    %c1_i32 = arith.constant 1 : i32
    %7 = arith.select %6, %c1_i32, %c16_i32 : i32
    %8 = vector.broadcast %7 : i32 to vector<32x128xi32>
    %9 = arith.remsi %5, %8 : vector<32x128xi32>
    %c0_i32_9 = arith.constant 0 : i32
    %10 = vector.broadcast %c0_i32_9 : i32 to vector<32x128xi32>
    %11 = arith.cmpi ne, %9, %10 : vector<32x128xi32>
    %c0_i32_10 = arith.constant 0 : i32
    %12 = vector.broadcast %c0_i32_10 : i32 to vector<32x128xi32>
    %13 = arith.cmpi slt, %9, %12 : vector<32x128xi32>
    %c0_i32_11 = arith.constant 0 : i32
    %14 = arith.cmpi slt, %7, %c0_i32_11 : i32
    %15 = vector.broadcast %14 : i1 to vector<32x128xi1>
    %16 = vector.broadcast %15 : vector<32x128xi1> to vector<32x128xi1>
    %17 = arith.xori %13, %16 : vector<32x128xi1>
    %18 = arith.andi %17, %11 : vector<32x128xi1>
    %19 = vector.broadcast %7 : i32 to vector<32x128xi32>
    %20 = arith.addi %9, %19 : vector<32x128xi32>
    %21 = arith.select %18, %20, %9 : vector<32x128xi1>, vector<32x128xi32>
    %c0_i32_12 = arith.constant 0 : i32
    %22 = vector.broadcast %c0_i32_12 : i32 to vector<32x128xi32>
    %23 = arith.cmpi eq, %21, %22 : vector<32x128xi32>
    %c1_i32_13 = arith.constant 1 : i32
    %24 = tpu.dynamic_rotate %0 by %c1_i32_13 dim 0 : vector<32x128xf32>, i32 -> vector<32x128xf32>
    %cst = arith.constant 0.000000e+00 : f32
    %25 = vector.broadcast %cst : f32 to vector<32x128xf32>
    %26 = arith.select %23, %25, %24 : vector<32x128xi1>, vector<32x128xf32>
    %c16_i32_14 = arith.constant 16 : i32
    %c0_i32_15 = arith.constant 0 : i32
    %27 = arith.cmpi eq, %c16_i32_14, %c0_i32_15 : i32
    %c1_i32_16 = arith.constant 1 : i32
    %28 = arith.select %27, %c1_i32_16, %c16_i32_14 : i32
    %29 = vector.broadcast %28 : i32 to vector<32x128xi32>
    %30 = arith.remsi %5, %29 : vector<32x128xi32>
    %c0_i32_17 = arith.constant 0 : i32
    %31 = vector.broadcast %c0_i32_17 : i32 to vector<32x128xi32>
    %32 = arith.cmpi ne, %30, %31 : vector<32x128xi32>
    %c0_i32_18 = arith.constant 0 : i32
    %33 = vector.broadcast %c0_i32_18 : i32 to vector<32x128xi32>
    %34 = arith.cmpi slt, %30, %33 : vector<32x128xi32>
    %c0_i32_19 = arith.constant 0 : i32
    %35 = arith.cmpi slt, %28, %c0_i32_19 : i32
    %36 = vector.broadcast %35 : i1 to vector<32x128xi1>
    %37 = vector.broadcast %36 : vector<32x128xi1> to vector<32x128xi1>
    %38 = arith.xori %34, %37 : vector<32x128xi1>
    %39 = arith.andi %38, %32 : vector<32x128xi1>
    %40 = vector.broadcast %28 : i32 to vector<32x128xi32>
    %41 = arith.addi %30, %40 : vector<32x128xi32>
    %42 = arith.select %39, %41, %30 : vector<32x128xi1>, vector<32x128xi32>
    %c15_i32 = arith.constant 15 : i32
    %43 = vector.broadcast %c15_i32 : i32 to vector<32x128xi32>
    %44 = arith.cmpi eq, %42, %43 : vector<32x128xi32>
    %c31_i32 = arith.constant 31 : i32
    %45 = tpu.dynamic_rotate %0 by %c31_i32 dim 0 : vector<32x128xf32>, i32 -> vector<32x128xf32>
    %cst_20 = arith.constant 0.000000e+00 : f32
    %46 = vector.broadcast %cst_20 : f32 to vector<32x128xf32>
    %47 = arith.select %44, %46, %45 : vector<32x128xi1>, vector<32x128xf32>
    %48 = tpu.concatenate %26, %0, %47 in 1 : vector<32x128xf32>, vector<32x128xf32>, vector<32x128xf32> -> vector<32x384xf32>
    %c0_21 = arith.constant 0 : index
    %c0_22 = arith.constant 0 : index
    %49 = vector.load %arg1[%c0_21, %c0_22] : memref<384x128xf32, #tpu.memory_space<vmem>>, vector<384x128xf32>
    %cst_23 = arith.constant dense<0.000000e+00> : vector<32x128xf32>
    %50 = tpu.matmul %48, %49, %cst_23 {dimension_numbers = #tpu.dot_dimension_numbers<[1], [0], [0], [1], [0, 0, 1, 1], [], []>} : vector<32x384xf32>, vector<384x128xf32>, vector<32x128xf32> -> vector<32x128xf32>
    %51 = vector.broadcast %4 : vector<1x128xf32> to vector<32x128xf32>
    %52 = arith.addf %50, %51 : vector<32x128xf32>
    %cst_24 = arith.constant dense<0.000000e+00> : vector<128xf32>
    %53 = vector.multi_reduction <add>, %52, %cst_24 [0] : vector<32x128xf32> to vector<128xf32>
    %54 = vector.shape_cast %53 : vector<128xf32> to vector<1x128xf32>
    %55 = arith.mulf %52, %52 : vector<32x128xf32>
    %cst_25 = arith.constant dense<0.000000e+00> : vector<128xf32>
    %56 = vector.multi_reduction <add>, %55, %cst_25 [0] : vector<32x128xf32> to vector<128xf32>
    %57 = vector.shape_cast %56 : vector<128xf32> to vector<1x128xf32>
    %cst_26 = arith.constant dense<0.000000e+00> : vector<1x128xf32>
    %58 = tpu.matmul %54, %1, %cst_26 {dimension_numbers = #tpu.dot_dimension_numbers<[1], [0], [0], [1], [0, 0, 1, 1], [], []>} : vector<1x128xf32>, vector<128x128xf32>, vector<1x128xf32> -> vector<1x128xf32>
    %cst_27 = arith.constant dense<0.000000e+00> : vector<1x128xf32>
    %59 = tpu.matmul %57, %1, %cst_27 {dimension_numbers = #tpu.dot_dimension_numbers<[1], [0], [0], [1], [0, 0, 1, 1], [], []>} : vector<1x128xf32>, vector<128x128xf32>, vector<1x128xf32> -> vector<1x128xf32>
    %cst_28 = arith.constant 0.001953125 : f32
    %60 = vector.broadcast %cst_28 : f32 to vector<1x128xf32>
    %61 = arith.mulf %58, %60 : vector<1x128xf32>
    %cst_29 = arith.constant 0.001953125 : f32
    %62 = vector.broadcast %cst_29 : f32 to vector<1x128xf32>
    %63 = arith.mulf %59, %62 : vector<1x128xf32>
    %64 = arith.mulf %61, %61 : vector<1x128xf32>
    %65 = arith.subf %63, %64 : vector<1x128xf32>
    %cst_30 = arith.constant 9.99999974E-6 : f32
    %66 = vector.broadcast %cst_30 : f32 to vector<1x128xf32>
    %67 = arith.addf %65, %66 : vector<1x128xf32>
    %68 = math.rsqrt %67 : vector<1x128xf32>
    %69 = arith.mulf %2, %68 : vector<1x128xf32>
    %70 = arith.mulf %61, %69 : vector<1x128xf32>
    %71 = arith.subf %3, %70 : vector<1x128xf32>
    %72 = vector.broadcast %69 : vector<1x128xf32> to vector<32x128xf32>
    %73 = arith.mulf %52, %72 : vector<32x128xf32>
    %74 = vector.broadcast %71 : vector<1x128xf32> to vector<32x128xf32>
    %75 = arith.addf %73, %74 : vector<32x128xf32>
    %cst_31 = arith.constant 0.000000e+00 : f32
    %76 = vector.broadcast %cst_31 : f32 to vector<32x128xf32>
    %77 = arith.maximumf %75, %76 : vector<32x128xf32>
    %c0_32 = arith.constant 0 : index
    %c0_33 = arith.constant 0 : index
    %78 = vector.load %arg4[%c0_32, %c0_33] : memref<1x128xf32, #tpu.memory_space<vmem>>, vector<1x128xf32>
    %79 = tpu.iota {dimensions = array<i32: 0>} : vector<32x128xi32>
    %c16_i32_34 = arith.constant 16 : i32
    %c0_i32_35 = arith.constant 0 : i32
    %80 = arith.cmpi eq, %c16_i32_34, %c0_i32_35 : i32
    %c1_i32_36 = arith.constant 1 : i32
    %81 = arith.select %80, %c1_i32_36, %c16_i32_34 : i32
    %82 = vector.broadcast %81 : i32 to vector<32x128xi32>
    %83 = arith.remsi %79, %82 : vector<32x128xi32>
    %c0_i32_37 = arith.constant 0 : i32
    %84 = vector.broadcast %c0_i32_37 : i32 to vector<32x128xi32>
    %85 = arith.cmpi ne, %83, %84 : vector<32x128xi32>
    %c0_i32_38 = arith.constant 0 : i32
    %86 = vector.broadcast %c0_i32_38 : i32 to vector<32x128xi32>
    %87 = arith.cmpi slt, %83, %86 : vector<32x128xi32>
    %c0_i32_39 = arith.constant 0 : i32
    %88 = arith.cmpi slt, %81, %c0_i32_39 : i32
    %89 = vector.broadcast %88 : i1 to vector<32x128xi1>
    %90 = vector.broadcast %89 : vector<32x128xi1> to vector<32x128xi1>
    %91 = arith.xori %87, %90 : vector<32x128xi1>
    %92 = arith.andi %91, %85 : vector<32x128xi1>
    %93 = vector.broadcast %81 : i32 to vector<32x128xi32>
    %94 = arith.addi %83, %93 : vector<32x128xi32>
    %95 = arith.select %92, %94, %83 : vector<32x128xi1>, vector<32x128xi32>
    %c0_i32_40 = arith.constant 0 : i32
    %96 = vector.broadcast %c0_i32_40 : i32 to vector<32x128xi32>
    %97 = arith.cmpi eq, %95, %96 : vector<32x128xi32>
    %c1_i32_41 = arith.constant 1 : i32
    %98 = tpu.dynamic_rotate %77 by %c1_i32_41 dim 0 : vector<32x128xf32>, i32 -> vector<32x128xf32>
    %cst_42 = arith.constant 0.000000e+00 : f32
    %99 = vector.broadcast %cst_42 : f32 to vector<32x128xf32>
    %100 = arith.select %97, %99, %98 : vector<32x128xi1>, vector<32x128xf32>
    %c16_i32_43 = arith.constant 16 : i32
    %c0_i32_44 = arith.constant 0 : i32
    %101 = arith.cmpi eq, %c16_i32_43, %c0_i32_44 : i32
    %c1_i32_45 = arith.constant 1 : i32
    %102 = arith.select %101, %c1_i32_45, %c16_i32_43 : i32
    %103 = vector.broadcast %102 : i32 to vector<32x128xi32>
    %104 = arith.remsi %79, %103 : vector<32x128xi32>
    %c0_i32_46 = arith.constant 0 : i32
    %105 = vector.broadcast %c0_i32_46 : i32 to vector<32x128xi32>
    %106 = arith.cmpi ne, %104, %105 : vector<32x128xi32>
    %c0_i32_47 = arith.constant 0 : i32
    %107 = vector.broadcast %c0_i32_47 : i32 to vector<32x128xi32>
    %108 = arith.cmpi slt, %104, %107 : vector<32x128xi32>
    %c0_i32_48 = arith.constant 0 : i32
    %109 = arith.cmpi slt, %102, %c0_i32_48 : i32
    %110 = vector.broadcast %109 : i1 to vector<32x128xi1>
    %111 = vector.broadcast %110 : vector<32x128xi1> to vector<32x128xi1>
    %112 = arith.xori %108, %111 : vector<32x128xi1>
    %113 = arith.andi %112, %106 : vector<32x128xi1>
    %114 = vector.broadcast %102 : i32 to vector<32x128xi32>
    %115 = arith.addi %104, %114 : vector<32x128xi32>
    %116 = arith.select %113, %115, %104 : vector<32x128xi1>, vector<32x128xi32>
    %c15_i32_49 = arith.constant 15 : i32
    %117 = vector.broadcast %c15_i32_49 : i32 to vector<32x128xi32>
    %118 = arith.cmpi eq, %116, %117 : vector<32x128xi32>
    %c31_i32_50 = arith.constant 31 : i32
    %119 = tpu.dynamic_rotate %77 by %c31_i32_50 dim 0 : vector<32x128xf32>, i32 -> vector<32x128xf32>
    %cst_51 = arith.constant 0.000000e+00 : f32
    %120 = vector.broadcast %cst_51 : f32 to vector<32x128xf32>
    %121 = arith.select %118, %120, %119 : vector<32x128xi1>, vector<32x128xf32>
    %122 = tpu.concatenate %100, %77, %121 in 1 : vector<32x128xf32>, vector<32x128xf32>, vector<32x128xf32> -> vector<32x384xf32>
    %c0_52 = arith.constant 0 : index
    %c0_53 = arith.constant 0 : index
    %123 = vector.load %arg3[%c0_52, %c0_53] : memref<384x128xf32, #tpu.memory_space<vmem>>, vector<384x128xf32>
    %cst_54 = arith.constant dense<0.000000e+00> : vector<32x128xf32>
    %124 = tpu.matmul %122, %123, %cst_54 {dimension_numbers = #tpu.dot_dimension_numbers<[1], [0], [0], [1], [0, 0, 1, 1], [], []>} : vector<32x384xf32>, vector<384x128xf32>, vector<32x128xf32> -> vector<32x128xf32>
    %125 = vector.broadcast %78 : vector<1x128xf32> to vector<32x128xf32>
    %126 = arith.addf %124, %125 : vector<32x128xf32>
    %cst_55 = arith.constant dense<0.000000e+00> : vector<128xf32>
    %127 = vector.multi_reduction <add>, %126, %cst_55 [0] : vector<32x128xf32> to vector<128xf32>
    %128 = vector.shape_cast %127 : vector<128xf32> to vector<1x128xf32>
    %129 = arith.mulf %126, %126 : vector<32x128xf32>
    %cst_56 = arith.constant dense<0.000000e+00> : vector<128xf32>
    %130 = vector.multi_reduction <add>, %129, %cst_56 [0] : vector<32x128xf32> to vector<128xf32>
    %131 = vector.shape_cast %130 : vector<128xf32> to vector<1x128xf32>
    %cst_57 = arith.constant dense<0.000000e+00> : vector<1x128xf32>
    %132 = tpu.matmul %128, %1, %cst_57 {dimension_numbers = #tpu.dot_dimension_numbers<[1], [0], [0], [1], [0, 0, 1, 1], [], []>} : vector<1x128xf32>, vector<128x128xf32>, vector<1x128xf32> -> vector<1x128xf32>
    %cst_58 = arith.constant dense<0.000000e+00> : vector<1x128xf32>
    %133 = tpu.matmul %131, %1, %cst_58 {dimension_numbers = #tpu.dot_dimension_numbers<[1], [0], [0], [1], [0, 0, 1, 1], [], []>} : vector<1x128xf32>, vector<128x128xf32>, vector<1x128xf32> -> vector<1x128xf32>
    %cst_59 = arith.constant 0.001953125 : f32
    %134 = vector.broadcast %cst_59 : f32 to vector<1x128xf32>
    %135 = arith.mulf %132, %134 : vector<1x128xf32>
    %cst_60 = arith.constant 0.001953125 : f32
    %136 = vector.broadcast %cst_60 : f32 to vector<1x128xf32>
    %137 = arith.mulf %133, %136 : vector<1x128xf32>
    %138 = arith.mulf %135, %135 : vector<1x128xf32>
    %139 = arith.subf %137, %138 : vector<1x128xf32>
    %cst_61 = arith.constant 9.99999974E-6 : f32
    %140 = vector.broadcast %cst_61 : f32 to vector<1x128xf32>
    %141 = arith.addf %139, %140 : vector<1x128xf32>
    %142 = math.rsqrt %141 : vector<1x128xf32>
    %143 = arith.mulf %2, %142 : vector<1x128xf32>
    %144 = arith.mulf %135, %143 : vector<1x128xf32>
    %145 = arith.subf %3, %144 : vector<1x128xf32>
    %146 = vector.broadcast %143 : vector<1x128xf32> to vector<32x128xf32>
    %147 = arith.mulf %126, %146 : vector<32x128xf32>
    %148 = arith.addf %77, %147 : vector<32x128xf32>
    %149 = vector.broadcast %145 : vector<1x128xf32> to vector<32x128xf32>
    %150 = arith.addf %148, %149 : vector<32x128xf32>
    %cst_62 = arith.constant 0.000000e+00 : f32
    %151 = vector.broadcast %cst_62 : f32 to vector<32x128xf32>
    %152 = arith.maximumf %150, %151 : vector<32x128xf32>
    %c0_63 = arith.constant 0 : index
    %c0_64 = arith.constant 0 : index
    %153 = vector.load %arg8[%c0_63, %c0_64] : memref<32x128xf32, #tpu.memory_space<vmem>>, vector<32x128xf32>
    tpu.vector_store %arg8[%c0_63, %c0_64], %152 {strides = array<i32>} : memref<32x128xf32, #tpu.memory_space<vmem>>, vector<32x128xf32>,
    return
  }
}

</mosaic_0001>

<bundles_post_ra>
// kernel: tpu_custom_call.1
= control target key start
LH: loop header
LB: loop body
LE: loop exit
PB: predicated region body
PF: predicated region fallthrough
CT: control target
= control target key end

     0   :  { %13 = vsyncpa [#allocation3], 0  ;;  %s2268_s0 = inlined_call_operand.hbm [shape: f32[32,128], index: 0, kind: input, shape index: {}]   ;;  %s2269_s1 = inlined_call_operand.hbm [shape: f32[384,128], index: 1, kind: input, shape index: {}]   ;;  %s2270_s2 = inlined_call_operand.vmem [shape: f32[1,128], index: 2, kind: input, shape index: {}]   ;;  %s2271_s3 = inlined_call_operand.hbm [shape: f32[384,128], index: 3, kind: input, shape index: {}]   ;;  %s2272_s4 = inlined_call_operand.vmem [shape: f32[1,128], index: 4, kind: input, shape index: {}]   ;;  %s2273_s5 = inlined_call_operand.vmem [shape: f32[1,128], index: 5, kind: input, shape index: {}]   ;;  %s2274_s6 = inlined_call_operand.vmem [shape: f32[1,128], index: 6, kind: input, shape index: {}]   ;;  %s2275_s7 = inlined_call_operand.hbm [shape: f32[128,128], index: 7, kind: input, shape index: {}]   ;;  %s2276_s8 = inlined_call_operand.hbm [shape: f32[32,128], index: 8, kind: output, shape index: {}]  }
   0x1   :  { %14 = vsyncpa [#allocation6], 0 }
   0x2   :  { %15 = vsyncpa [#allocation9], 0 }
   0x3   :  { %16 = vsyncpa [#allocation4], 0  ;;  %s1875_s27 = smov [#allocation5]   ;;  %s1876_s29 = smov [#allocation2]  }
   0x4   :  { %s34_s28 = sshll.u32 %s1875_s27, 4  ;;  %s22_s30 = sshll.u32 %s1876_s29, 4  ;;  %s35_s28 = int_to_ptr.vmem [resolvable:$true] %s34_s28  ;;  %s1930_s30 = int_to_ptr.vmem [resolvable:$true] %s22_s30 }
   0x5   :  { %s1757_s11 = scalar_lea.hbm %s2269_s1, 6144 }
   0x6   :  { %p1758_p0 = scmp.ne.s32.totalorder %s2269_s1, %s1757_s11  ;;  %p1761_p1 = scmp.lt.u32.totalorder %s1757_s11, %s2269_s1 }
   0x8   :  { %p1763_p2 = pnand %p1761_p1, %p1758_p0 }
   0xa   :  { %1766 = shalt.err (!%p1763_p2)
}
   0xb   :  { %s1767_s16 = scalar_lea.vmem %s35_s28, 6144  ;;  %p1772_p4 = scmp.lt.s32.totalorder %s35_s28, %s35_s28 }
   0xc   :  { %p1768_p3 = scmp.ne.s32.totalorder %s35_s28, %s1767_s16  ;;  %p1773_p5 = scmp.lt.s32.totalorder %s1767_s16, %s1767_s16 }
   0xe   :  { %p1774_p6 = por %p1773_p5, %p1772_p4 }
  0x10   :  { %p1775_p7 = pnand %p1774_p6, %p1768_p3 }
  0x12   :  { %1778 = shalt.err (!%p1775_p7)
}
  0x13   :  { %s1877_s17 = smov 128   ;;  %s1878_s18 = smov 8  }
  0x14   :  { %40 = dma.hbm_to_vmem [thread:$0]  %s2269_s1, 6144, %s35_s28, [#allocation6], %s1877_s17, %s1877_s17, %s1878_s18  }
  0x15   :  { %s1779_s23 = scalar_lea.hbm %s2268_s0, 512 }
  0x16   :  { %p1780_p8 = scmp.ne.s32.totalorder %s2268_s0, %s1779_s23  ;;  %p1783_p9 = scmp.lt.u32.totalorder %s1779_s23, %s2268_s0 }
  0x18   :  { %p1785_p10 = pnand %p1783_p9, %p1780_p8 }
  0x1a   :  { %1788 = shalt.err (!%p1785_p10)
}
  0x1b   :  { %s1789_s29 = scalar_lea.vmem %s1930_s30, 512  ;;  %p1794_p12 = scmp.lt.s32.totalorder %s1930_s30, %s1930_s30 }
  0x1c   :  { %p1790_p11 = scmp.ne.s32.totalorder %s1930_s30, %s1789_s29  ;;  %p1795_p13 = scmp.lt.s32.totalorder %s1789_s29, %s1789_s29 }
  0x1e   :  { %p1796_p0 = por %p1795_p13, %p1794_p12 }
  0x20   :  { %p1797_p1 = pnand %p1796_p0, %p1790_p11 }
  0x22   :  { %1800 = shalt.err (!%p1797_p1)
}
  0x23   :  { %28 = dma.hbm_to_vmem [thread:$0]  %s2268_s0, 512, %s1930_s30, [#allocation3], %s1877_s17, %s1877_s17, %s1878_s18  }
  0x24   :  { %s1879_s9 = smov [#allocation7]   ;;  %s1880_s11 = smov [#allocation8]  }
  0x25   :  { %s48_s10 = sshll.u32 %s1879_s9, 4  ;;  %s66_s12 = sshll.u32 %s1880_s11, 4  ;;  %s49_s10 = int_to_ptr.vmem [resolvable:$true] %s48_s10  ;;  %s1967_s12 = int_to_ptr.vmem [resolvable:$true] %s66_s12 }
  0x26   :  { %s1801_s15 = scalar_lea.hbm %s2271_s3, 6144 }
  0x27   :  { %p1802_p2 = scmp.ne.s32.totalorder %s2271_s3, %s1801_s15  ;;  %p1805_p3 = scmp.lt.u32.totalorder %s1801_s15, %s2271_s3 }
  0x29   :  { %p1807_p4 = pnand %p1805_p3, %p1802_p2 }
  0x2b   :  { %1810 = shalt.err (!%p1807_p4)
}
  0x2c   :  { %s1811_s0 = scalar_lea.vmem %s49_s10, 6144  ;;  %p1816_p6 = scmp.lt.s32.totalorder %s49_s10, %s49_s10 }
  0x2d   :  { %p1812_p5 = scmp.ne.s32.totalorder %s49_s10, %s1811_s0  ;;  %p1817_p7 = scmp.lt.s32.totalorder %s1811_s0, %s1811_s0 }
  0x2f   :  { %p1818_p8 = por %p1817_p7, %p1816_p6 }
  0x31   :  { %p1819_p9 = pnand %p1818_p8, %p1812_p5 }
  0x33   :  { %1822 = shalt.err (!%p1819_p9)
}
  0x34   :  { %54 = dma.hbm_to_vmem [thread:$0]  %s2271_s3, 6144, %s49_s10, [#allocation6], %s1877_s17, %s1877_s17, %s1878_s18  }
  0x35   :  { %s1823_s25 = scalar_lea.hbm %s2275_s7, 2048 }
  0x36   :  { %p1824_p10 = scmp.ne.s32.totalorder %s2275_s7, %s1823_s25  ;;  %p1827_p11 = scmp.lt.u32.totalorder %s1823_s25, %s2275_s7 }
  0x38   :  { %p1829_p12 = pnand %p1827_p11, %p1824_p10 }
  0x3a   :  { %1832 = shalt.err (!%p1829_p12)
}
  0x3b   :  { %s1833_s28 = scalar_lea.vmem %s1967_s12, 2048  ;;  %p1838_p0 = scmp.lt.s32.totalorder %s1967_s12, %s1967_s12 }
  0x3c   :  { %p1834_p13 = scmp.ne.s32.totalorder %s1967_s12, %s1833_s28  ;;  %p1839_p1 = scmp.lt.s32.totalorder %s1833_s28, %s1833_s28 }
  0x3e   :  { %p1840_p2 = por %p1839_p1, %p1838_p0 }
  0x40   :  { %p1841_p3 = pnand %p1840_p2, %p1834_p13 }
  0x42   :  { %1844 = shalt.err (!%p1841_p3)
}
  0x43   :  { %72 = dma.hbm_to_vmem [thread:$0]  %s2275_s7, 2048, %s1967_s12, [#allocation9], %s1877_s17, %s1877_s17, %s1878_s18  }
  0x44   :  { %1867 = dma.done.wait [#allocation3], 512  }
  0x45   :  { %1868 = vsyncadd [#allocation3], 4294966784 }
  0x46   :  { %1869 = dma.done.wait [#allocation6], 12288  }
  0x47   :  { %1870 = vsyncadd [#allocation6], 4294955008 }
  0x48   :  { %1871 = dma.done.wait [#allocation9], 2048  }
  0x49   :  { %1872 = vsyncadd [#allocation9], 4294965248  ;;  %v211_v0 = vld [vmem:[#allocation5 + $0x80] sm:$0xff]  ;;  %v212_v1 = vld [vmem:[#allocation5 + $0x88] sm:$0xff]  ;;  %v108_v36 = vlaneseq  ;;  %vm1882_vm6 = vmmov 0  }
  0x4a   :  { %v195_v2 = vld [vmem:[#allocation5] sm:$0xff]  ;;  %v1519_v3 = vpack.c.bf16 %v212_v1, %v211_v0  ;;  %v196_v4 = vld [vmem:[#allocation5 + $0x8] sm:$0xff]  ;;  %v213_v5 = vld [vmem:[#allocation5 + $0x90] sm:$0xff] }
  0x4b   :  { %v214_v6 = vld [vmem:[#allocation5 + $0x98] sm:$0xff]  ;;  %v1521_v7 = vpack.c.bf16 %v196_v4, %v195_v2  ;;  %v227_v9 = vld [vmem:[#allocation5 + $0x100] sm:$0xff]  ;;  %v228_v10 = vld [vmem:[#allocation5 + $0x108] sm:$0xff]  ;;  %v2004_v46 = vshrl.u32 %v108_v36, 7 }
  0x4c   :  { %v1523_v8 = vpack.c.bf16 %v214_v6, %v213_v5  ;;  %v197_v11 = vld [vmem:[#allocation5 + $0x10] sm:$0xff]  ;;  %1520 = vmatprep.subr.bf16.mxu0 %v1519_v3  ;;  %v1551_v12 = vpack.c.bf16 %v228_v10, %v227_v9  ;;  %v198_v13 = vld [vmem:[#allocation5 + $0x18] sm:$0xff]  ;;  %v215_v14 = vld [vmem:[#allocation5 + $0xa0] sm:$0xff] }
  0x4d   :  { %v216_v15 = vld [vmem:[#allocation5 + $0xa8] sm:$0xff]  ;;  %1522 = vmatpush3.bf16.msra.mxu0 %v1521_v7  ;;  %v1525_v16 = vpack.c.bf16 %v198_v13, %v197_v11  ;;  %v229_v17 = vld [vmem:[#allocation5 + $0x110] sm:$0xff]  ;;  %v230_v18 = vld [vmem:[#allocation5 + $0x118] sm:$0xff]  ;;  %vm186_vm0 = vcmp.lt.s32.totalorder %v2004_v46, 7  ;;  %vm169_vm1 = vcmp.lt.s32.totalorder %v2004_v46, 1 }
  0x4e   :  { %1524 = vmatprep.subr.bf16.mxu0 %v1523_v8  ;;  %1552 = vmatprep.subr.bf16.mxu1 %v1551_v12  ;;  %v1527_v19 = vpack.c.bf16 %v216_v15, %v215_v14  ;;  %v1555_v20 = vpack.c.bf16 %v230_v18, %v229_v17  ;;  %v199_v21 = vld [vmem:[#allocation5 + $0x20] sm:$0xff]  ;;  %v200_v22 = vld [vmem:[#allocation5 + $0x28] sm:$0xff]  ;;  %v217_v23 = vld [vmem:[#allocation5 + $0xb0] sm:$0xff]  ;;  %v110_v14 = vadd.s32 8, %v2004_v46 }
  0x4f   :  { %1554 = vmatpush3.bf16.msra.mxu1 %v1551_v12  ;;  %v218_v24 = vld [vmem:[#allocation5 + $0xb8] sm:$0xff]  ;;  %v231_v25 = vld [vmem:[#allocation5 + $0x120] sm:$0xff]  ;;  %v232_v26 = vld [vmem:[#allocation5 + $0x128] sm:$0xff]  ;;  %v1529_v28 = vpack.c.bf16 %v200_v22, %v199_v21 }
  0x50   :  { %1556 = vmatprep.subr.bf16.mxu1 %v1555_v20  ;;  %v1559_v27 = vpack.c.bf16 %v232_v26, %v231_v25  ;;  %v233_v29 = vld [vmem:[#allocation5 + $0x130] sm:$0xff]  ;;  %v234_v30 = vld [vmem:[#allocation5 + $0x138] sm:$0xff]  ;;  %v1531_v31 = vpack.c.bf16 %v218_v24, %v217_v23  ;;  %v219_v34 = vld [vmem:[#allocation5 + $0xc0] sm:$0xff]  ;;  %v124_v21 = vand.u32 15, %v110_v14  ;;  %v112_v23 = vadd.s32 24, %v2004_v46 }
  0x51   :  { %1526 = vmatpush3.bf16.msra.mxu0 %v1525_v16  ;;  %v201_v32 = vld [vmem:[#allocation5 + $0x30] sm:$0xff]  ;;  %v202_v33 = vld [vmem:[#allocation5 + $0x38] sm:$0xff]  ;;  %v220_v35 = vld [vmem:[#allocation5 + $0xc8] sm:$0xff]  ;;  %v1563_v37 = vpack.c.bf16 %v234_v30, %v233_v29 }
  0x52   :  { %1528 = vmatprep.subr.bf16.mxu0 %v1527_v19  ;;  %v1533_v38 = vpack.c.bf16 %v202_v33, %v201_v32  ;;  %v235_v39 = vld [vmem:[#allocation5 + $0x140] sm:$0xff]  ;;  %v236_v40 = vld [vmem:[#allocation5 + $0x148] sm:$0xff]  ;;  %v1535_v41 = vpack.c.bf16 %v220_v35, %v219_v34  ;;  %v221_v44 = vld [vmem:[#allocation5 + $0xd0] sm:$0xff]  ;;  %v117_v19 = vand.u32 15, %v2004_v46  ;;  %vm2033_vm3 = vcmp.ne.s32.totalorder %v124_v21, 15 }
  0x53   :  { %1558 = vmatpush3.bf16.msra.mxu1 %v1555_v20  ;;  %v203_v42 = vld [vmem:[#allocation5 + $0x40] sm:$0xff]  ;;  %v204_v43 = vld [vmem:[#allocation5 + $0x48] sm:$0xff]  ;;  %v222_v45 = vld [vmem:[#allocation5 + $0xd8] sm:$0xff]  ;;  %v1567_v47 = vpack.c.bf16 %v236_v40, %v235_v39 }
  0x54   :  { %1560 = vmatprep.subr.bf16.mxu1 %v1559_v27  ;;  %v2006_v48 = vld [vmem:[#allocation2] sm:$0xff]  ;;  %v1537_v49 = vpack.c.bf16 %v204_v43, %v203_v42  ;;  %v237_v50 = vld [vmem:[#allocation5 + $0x150] sm:$0xff]  ;;  %v238_v51 = vld [vmem:[#allocation5 + $0x158] sm:$0xff]  ;;  %v1539_v54 = vpack.c.bf16 %v222_v45, %v221_v44  ;;  %vm2025_vm2 = vcmp.ne.s32.totalorder %v117_v19, 0  ;;  %v1881_v44 = vmov 0.0|0.0  }
  0x55   :  { %1530 = vmatpush3.bf16.msra.mxu0 %v1529_v28  ;;  %v182_v52 = vrot.slane %v2006_v48, 1  ;;  %313 = vmatprep.mubr.f32.mxu0 %v2006_v48  ;;  %v2010_v53 = vld [vmem:[#allocation2 + $0x8] sm:$0xff]  ;;  %v205_v55 = vld [vmem:[#allocation5 + $0x50] sm:$0xff]  ;;  %v206_v56 = vld [vmem:[#allocation5 + $0x58] sm:$0xff]  ;;  %v1571_v60 = vpack.c.bf16 %v238_v51, %v237_v50  ;;  %v165_v18 = vrot.slane %v2006_v48, 7  ;;  %v111_v28 = vadd.s32 16, %v2004_v46 }
  0x56   :  { %1532 = vmatprep.subr.bf16.mxu0 %v1531_v31  ;;  %v183_v57 = vrot.slane %v2010_v53, 1  ;;  %v223_v58 = vld [vmem:[#allocation5 + $0xe0] sm:$0xff]  ;;  %v224_v59 = vld [vmem:[#allocation5 + $0xe8] sm:$0xff]  ;;  %v1541_v62 = vpack.c.bf16 %v206_v56, %v205_v55  ;;  %v225_v4 = vld [vmem:[#allocation5 + $0xf0] sm:$0xff]  ;;  %v138_v31 = vand.u32 15, %v112_v23 }
  0x57   :  { %1562 = vmatpush3.bf16.msra.mxu1 %v1559_v27  ;;  %v239_v63 = vld [vmem:[#allocation5 + $0x160] sm:$0xff]  ;;  %v240_v0 = vld [vmem:[#allocation5 + $0x168] sm:$0xff]  ;;  %v1543_v1 = vpack.c.bf16 %v224_v59, %v223_v58  ;;  %v226_v5 = vld [vmem:[#allocation5 + $0xf8] sm:$0xff]  ;;  %v166_v27 = vrot.slane %v2010_v53, 7  ;;  %v131_v34 = vand.u32 15, %v111_v28 }
  0x58   :  { %1564 = vmatprep.subr.bf16.mxu1 %v1563_v37  ;;  %v189_v61 = vsel %vm186_vm0, %v182_v52, %v183_v57  ;;  %v207_v2 = vld [vmem:[#allocation5 + $0x60] sm:$0xff]  ;;  %v208_v3 = vld [vmem:[#allocation5 + $0x68] sm:$0xff]  ;;  %v1575_v6 = vpack.c.bf16 %v240_v0, %v239_v63  ;;  %v241_v8 = vld [vmem:[#allocation5 + $0x170] sm:$0xff]  ;;  %v1547_v10 = vpack.c.bf16 %v226_v5, %v225_v4  ;;  %vm2050_vm4 = vcmp.ne.s32.totalorder %v138_v31, 15 }
  0x59   :  { %1534 = vmatpush3.bf16.msra.mxu0 %v1533_v38  ;;  %1335 = vmatprep.mubr.f32.mxu1 %v189_v61  ;;  %v1545_v7 = vpack.c.bf16 %v208_v3, %v207_v2  ;;  %v242_v9 = vld [vmem:[#allocation5 + $0x178] sm:$0xff]  ;;  %v209_v11 = vld [vmem:[#allocation5 + $0x70] sm:$0xff]  ;;  %v172_v33 = vsel %vm169_vm1, %v165_v18, %v166_v27  ;;  %vm2056_vm5 = vcmp.ne.s32.totalorder %v131_v34, 0  ;;  %v90_v42 = vld [vmem:[#allocation8 + $0x8] sm:$0xff]  ;;  %v1883_v3 = vmov 0.0  }
  0x5a   :  { %1536 = vmatprep.subr.bf16.mxu0 %v1535_v41  ;;  %v210_v12 = vld [vmem:[#allocation5 + $0x78] sm:$0xff]  ;;  %v1579_v15 = vpack.c.bf16 %v242_v9, %v241_v8  ;;  %v87_v16 = vld [vmem:[#allocation2 + $0x10] sm:$0xff]  ;;  %v89_v41 = vld [vmem:[#allocation8] sm:$0xff] }
  0x5b   :  { %1566 = vmatpush3.bf16.msra.mxu1 %v1563_v37  ;;  %v88_v13 = vld [vmem:[#allocation2 + $0x18] sm:$0xff]  ;;  %v1549_v17 = vpack.c.bf16 %v210_v12, %v209_v11  ;;  %v184_v22 = vrot.slane %v87_v16, 1  ;;  %v167_v35 = vrot.slane %v87_v16, 7  ;;  %v2066_v43 = vpack.c.bf16 %v90_v42, %v89_v41  ;;  %v91_v45 = vld [vmem:[#allocation8 + $0x10] sm:$0xff]  ;;  %v94_v50 = vld [vmem:[#allocation8 + $0x28] sm:$0xff] }
  0x5c   :  { %1568 = vmatprep.subr.bf16.mxu1 %v1567_v47  ;;  %v168_v20 = vrot.slane %v88_v13, 7  ;;  %v185_v24 = vrot.slane %v88_v13, 1  ;;  %v97_v55 = vld [vmem:[#allocation8 + $0x40] sm:$0xff]  ;;  %v98_v56 = vld [vmem:[#allocation8 + $0x48] sm:$0xff]  ;;  %v99_v58 = vld [vmem:[#allocation8 + $0x50] sm:$0xff] }
  0x5d   :  { %1538 = vmatpush3.bf16.msra.mxu0 %v1537_v49  ;;  %v188_v29 = vsel %vm186_vm0, %v183_v57, %v184_v22  ;;  %v171_v38 = vsel %vm169_vm1, %v166_v27, %v167_v35  ;;  %v93_v49 = vld [vmem:[#allocation8 + $0x20] sm:$0xff]  ;;  %v2092_v57 = vpack.c.bf16 %v98_v56, %v97_v55  ;;  %v100_v59 = vld [vmem:[#allocation8 + $0x58] sm:$0xff]  ;;  %v103_v0 = vld [vmem:[#allocation8 + $0x70] sm:$0xff] }
  0x5e   :  { %1540 = vmatprep.subr.bf16.mxu0 %v1539_v54  ;;  %v173_v25 = vsel %vm169_vm1, %v168_v20, %v165_v18  ;;  %v187_v32 = vsel %vm186_vm0, %v184_v22, %v185_v24  ;;  %v190_v36 = vsel %vm186_vm0, %v185_v24, %v182_v52  ;;  %v170_v40 = vsel %vm169_vm1, %v167_v35, %v168_v20  ;;  %v95_v52 = vld [vmem:[#allocation8 + $0x30] sm:$0xff]  ;;  %v101_v61 = vld [vmem:[#allocation8 + $0x60] sm:$0xff] }
  0x5f   :  { %1570 = vmatpush3.bf16.msra.mxu1 %v1567_v47  ;;  %v92_v47 = vld [vmem:[#allocation8 + $0x18] sm:$0xff]  ;;  %v2080_v51 = vpack.c.bf16 %v94_v50, %v93_v49 }
  0x60   :  { %1572 = vmatprep.subr.bf16.mxu1 %v1571_v60  ;;  %v2074_v48 = vpack.c.bf16 %v92_v47, %v91_v45 }
  0x61   :  { %1542 = vmatpush3.bf16.msra.mxu0 %v1541_v62  ;;  %v102_v62 = vld [vmem:[#allocation8 + $0x68] sm:$0xff] }
  0x62   :  { %1544 = vmatprep.subr.bf16.mxu0 %v1543_v1  ;;  %v2104_v63 = vpack.c.bf16 %v102_v62, %v101_v61  ;;  %v104_v1 = vld [vmem:[#allocation8 + $0x78] sm:$0xff] }
  0x63   :  { %1574 = vmatpush3.bf16.msra.mxu1 %v1571_v60  ;;  %v2098_v60 = vpack.c.bf16 %v100_v59, %v99_v58  ;;  %v2110_v2 = vpack.c.bf16 %v104_v1, %v103_v0  ;;  %v655_v0 = vld [vmem:[#allocation7 + $0x80] sm:$0xff]  ;;  %v656_v1 = vld [vmem:[#allocation7 + $0x88] sm:$0xff] }
  0x64   :  { %1576 = vmatprep.subr.bf16.mxu1 %v1575_v6 }
  0x65   :  { %1546 = vmatpush3.bf16.msra.mxu0 %v1545_v7 }
  0x66   :  { %1548 = vmatprep.subr.bf16.mxu0 %v1547_v10 }
  0x67   :  { %1578 = vmatpush3.bf16.msra.mxu1 %v1575_v6  ;;  %v1085_v6 = vld [vmem:[%s2270_s2] ss:$0 sm:$0xff] }
  0x68   :  { %1580 = vmatprep.subr.bf16.mxu1 %v1579_v15 }
  0x69   :  { %1550 = vmatpush3.bf16.msra.mxu0 %v1549_v17 }
  0x6a   :  { %1583 = vmatprep.subr.bf16.mxu0 %v1881_v44 }
  0x6b   :  { %1582 = vmatpush3.bf16.msra.mxu1 %v1579_v15 }
  0x6c   :  { %1087 = vmatmul.mubr.msk.f32.vlgmr.msra.gmra.mrb[0].mxu0 %vm2025_vm2, %v173_v25  ;;  %1607 = vmatprep.subr.bf16.mxu1 %v1881_v44 }
  0x6d   :  { %318 = vmatprep.mubr.f32.mxu0 %v2010_v53  ;;  %1585 = vmatpush3.bf16.msra.mxu0 %v2066_v43  ;;  %v96_v53 = vld [vmem:[#allocation8 + $0x38] sm:$0xff] }
  0x6e   :  { %1336 = vmatmul.mubr.msk.f32.vlgmr.msra.gmra.mrb[0].mxu1 %vm2033_vm3, %v188_v29  ;;  %1586 = vmatprep.subr.bf16.mxu0 %v1881_v44  ;;  %v2086_v54 = vpack.c.bf16 %v96_v53, %v95_v52 }
  0x6f   :  { %1338 = vmatprep.mubr.f32.mxu1 %v187_v32  ;;  %1609 = vmatpush3.bf16.msra.mxu1 %v2066_v43 }
  0x70   :  { %319 = vmatmul.mubr.f32.gmra.mrb[2].mxu0 %v172_v33  ;;  %1610 = vmatprep.subr.bf16.mxu1 %v1881_v44 }
  0x71   :  { %323 = vmatprep.mubr.f32.mxu0 %v87_v16  ;;  %1588 = vmatpush3.bf16.msra.mxu0 %v2074_v48 }
  0x72   :  { %1339 = vmatmul.mubr.msk.f32.gmra.mrb[2].mxu1 %vm2050_vm4, %v190_v36  ;;  %1589 = vmatprep.subr.bf16.mxu0 %v1881_v44 }
  0x73   :  { %1612 = vmatpush3.bf16.msra.mxu1 %v2074_v48  ;;  %1408 = vmatprep.mubr.msk.f32.mxu1 %vm1882_vm6, %v1883_v3 }
  0x74   :  { %1089 = vmatmul.mubr.msk.f32.gmra.mrb[4].mxu0 %vm2056_vm5, %v171_v38  ;;  %1613 = vmatprep.subr.bf16.mxu1 %v1881_v44 }
  0x75   :  { %328 = vmatprep.mubr.f32.mxu0 %v88_v13  ;;  %1591 = vmatpush3.bf16.msra.mxu0 %v2080_v51 }
  0x76   :  { %1592 = vmatprep.subr.bf16.mxu0 %v1881_v44 }
  0x77   :  { %1615 = vmatpush3.bf16.msra.mxu1 %v2080_v51 }
  0x78   :  { %329 = vmatmul.mubr.f32.gmra.mrb[6].mxu0 %v170_v40  ;;  %1616 = vmatprep.subr.bf16.mxu1 %v1881_v44 }
  0x79   :  { %1594 = vmatpush3.bf16.msra.mxu0 %v2086_v54  ;;  %1373 = vmatprep.mubr.msk.f32.mxu0 %vm1882_vm6, %v1883_v3 }
  0x7a   :  { %1595 = vmatprep.subr.bf16.mxu0 %v1881_v44 }
  0x7b   :  { %1618 = vmatpush3.bf16.msra.mxu1 %v2086_v54 }
  0x7c   :  { %1619 = vmatprep.subr.bf16.mxu1 %v1881_v44 }
  0x7d   :  { %1597 = vmatpush3.bf16.msra.mxu0 %v2092_v57 }
  0x7e   :  { %1598 = vmatprep.subr.bf16.mxu0 %v1881_v44 }
  0x7f   :  { %1621 = vmatpush3.bf16.msra.mxu1 %v2092_v57 }
  0x80   :  { %1622 = vmatprep.subr.bf16.mxu1 %v1881_v44 }
  0x81   :  { %1600 = vmatpush3.bf16.msra.mxu0 %v2098_v60 }
  0x82   :  { %1601 = vmatprep.subr.bf16.mxu0 %v1881_v44 }
  0x83   :  { %1624 = vmatpush3.bf16.msra.mxu1 %v2098_v60 }
  0x84   :  { %1625 = vmatprep.subr.bf16.mxu1 %v1881_v44 }
  0x85   :  { %1603 = vmatpush3.bf16.msra.mxu0 %v2104_v63 }
  0x86   :  { %1604 = vmatprep.subr.bf16.mxu0 %v1881_v44 }
  0x87   :  { %1627 = vmatpush3.bf16.msra.mxu1 %v2104_v63 }
  0x88   :  { %1628 = vmatprep.subr.bf16.mxu1 %v1881_v44 }
  0x89   :  { %1606 = vmatpush3.bf16.msra.mxu0 %v2110_v2 }
  0x8b   :  { %1630 = vmatpush3.bf16.msra.mxu1 %v2110_v2 }
 0x13f   :  { %v1139_v4 = vpop.f32.mrb[0].mxu0 }
 0x140   :  { %v1140_v5 = vpop.f32.mrb[1].mxu0 }
 0x141   :  { %v1141_v7 = vadd.f32 %v1140_v5, %v1139_v4  ;;  %v1337_v8 = vpop.f32.mrb[0].mxu1  ;;  %v1631_v4 = vpack.c.bf16 %v656_v1, %v655_v0  ;;  %v639_v5 = vld [vmem:[#allocation7] sm:$0xff]  ;;  %v665_v0 = vld [vmem:[#allocation7 + $0xd0] sm:$0xff]  ;;  %v666_v1 = vld [vmem:[#allocation7 + $0xd8] sm:$0xff] }
 0x142   :  { %v400_v9 = vpop.f32.mrb[1].mxu1 }
 0x143   :  { %v1142_v10 = vpop.f32.mrb[2].mxu0  ;;  %v316_v11 = vadd.f32 %v1141_v7, %v1085_v6  ;;  %v671_v7 = vld [vmem:[#allocation7 + $0x100] sm:$0xff]  ;;  %1632 = vmatprep.subr.bf16.mxu0 %v1631_v4  ;;  %v1651_v4 = vpack.c.bf16 %v666_v1, %v665_v0 }
 0x144   :  { %v1143_v12 = vpop.f32.mrb[3].mxu0 }
 0x145   :  { %v1144_v13 = vadd.f32 %v1143_v12, %v1142_v10  ;;  %v2121_v14 = vadd.f32 %v400_v9, %v316_v11  ;;  %v1340_v15 = vpop.f32.mrb[2].mxu1  ;;  %v672_v9 = vld [vmem:[#allocation7 + $0x108] sm:$0xff]  ;;  %v657_v11 = vld [vmem:[#allocation7 + $0x90] sm:$0xff]  ;;  %v658_v12 = vld [vmem:[#allocation7 + $0x98] sm:$0xff] }
 0x146   :  { %v410_v16 = vpop.f32.mrb[3].mxu1  ;;  %v1663_v10 = vpack.c.bf16 %v672_v9, %v671_v7  ;;  %v681_v7 = vld [vmem:[#allocation7 + $0x150] sm:$0xff]  ;;  %v682_v9 = vld [vmem:[#allocation7 + $0x158] sm:$0xff] }
 0x147   :  { %v321_v17 = vadd.f32 %v1144_v13, %v1085_v6  ;;  %v1145_v18 = vpop.f32.mrb[4].mxu0  ;;  %v428_v31 = vmul.f32 %v2121_v14, %v2121_v14  ;;  %v1635_v13 = vpack.c.bf16 %v658_v12, %v657_v11  ;;  %v668_v11 = vld [vmem:[#allocation7 + $0xe8] sm:$0xff]  ;;  %v1683_v12 = vpack.c.bf16 %v682_v9, %v681_v7 }
 0x148   :  { %v1146_v19 = vpop.f32.mrb[5].mxu0  ;;  %1664 = vmatprep.subr.bf16.mxu1 %v1663_v10 }
 0x149   :  { %v2123_v20 = vadd.f32 %v1337_v8, %v321_v17  ;;  %v1147_v21 = vadd.f32 %v1146_v19, %v1145_v18  ;;  %v673_v17 = vld [vmem:[#allocation7 + $0x110] sm:$0xff]  ;;  %v674_v19 = vld [vmem:[#allocation7 + $0x118] sm:$0xff] }
 0x14b   :  { %v1148_v22 = vpop.f32.mrb[6].mxu0  ;;  %v326_v23 = vadd.f32 %v1147_v21, %v1085_v6  ;;  %v429_v25 = vmul.f32 %v2123_v20, %v2123_v20  ;;  %v419_v29 = vadd.f32 %v2123_v20, %v2121_v14  ;;  %v1667_v21 = vpack.c.bf16 %v674_v19, %v673_v17  ;;  %v683_v17 = vld [vmem:[#allocation7 + $0x160] sm:$0xff]  ;;  %v684_v19 = vld [vmem:[#allocation7 + $0x168] sm:$0xff] }
 0x14c   :  { %v1149_v24 = vpop.f32.mrb[7].mxu0 }
 0x14d   :  { %v1150_v27 = vadd.f32 %v1149_v24, %v1148_v22  ;;  %v2127_v28 = vadd.f32 %v410_v16, %v326_v23  ;;  %v432_v34 = vadd.f32 %v429_v25, %v428_v31  ;;  %v642_v16 = vld [vmem:[#allocation7 + $0x18] sm:$0xff]  ;;  %v659_v22 = vld [vmem:[#allocation7 + $0xa0] sm:$0xff]  ;;  %v660_v23 = vld [vmem:[#allocation7 + $0xa8] sm:$0xff] }
 0x14e   :  { %v1639_v24 = vpack.c.bf16 %v660_v23, %v659_v22  ;;  %v643_v25 = vld [vmem:[#allocation7 + $0x20] sm:$0xff]  ;;  %v670_v22 = vld [vmem:[#allocation7 + $0xf8] sm:$0xff]  ;;  %v1687_v23 = vpack.c.bf16 %v684_v19, %v683_v17 }
 0x14f   :  { %v331_v32 = vadd.f32 %v1150_v27, %v1085_v6  ;;  %v430_v33 = vmul.f32 %v2127_v28, %v2127_v28  ;;  %v420_v36 = vadd.f32 %v419_v29, %v2127_v28  ;;  %v640_v6 = vld [vmem:[#allocation7 + $0x8] sm:$0xff]  ;;  %v675_v29 = vld [vmem:[#allocation7 + $0x120] sm:$0xff] }
 0x150   :  { %v1633_v8 = vpack.c.bf16 %v640_v6, %v639_v5  ;;  %v644_v27 = vld [vmem:[#allocation7 + $0x28] sm:$0xff]  ;;  %v649_v5 = vld [vmem:[#allocation7 + $0x50] sm:$0xff]  ;;  %v650_v6 = vld [vmem:[#allocation7 + $0x58] sm:$0xff] }
 0x151   :  { %v2135_v35 = vadd.f32 %v1340_v15, %v331_v32  ;;  %v433_v41 = vadd.f32 %v432_v34, %v430_v33  ;;  %v641_v15 = vld [vmem:[#allocation7 + $0x10] sm:$0xff]  ;;  %v1641_v31 = vpack.c.bf16 %v644_v27, %v643_v25  ;;  %v676_v32 = vld [vmem:[#allocation7 + $0x128] sm:$0xff]  ;;  %v654_v27 = vld [vmem:[#allocation7 + $0x78] sm:$0xff] }
 0x152   :  { %v1637_v18 = vpack.c.bf16 %v642_v16, %v641_v15  ;;  %v1671_v33 = vpack.c.bf16 %v676_v32, %v675_v29  ;;  %v661_v34 = vld [vmem:[#allocation7 + $0xb0] sm:$0xff]  ;;  %v651_v15 = vld [vmem:[#allocation7 + $0x60] sm:$0xff]  ;;  %v652_v16 = vld [vmem:[#allocation7 + $0x68] sm:$0xff] }
 0x153   :  { %v431_v38 = vmul.f32 %v2135_v35, %v2135_v35  ;;  %v421_v40 = vadd.f32 %v420_v36, %v2135_v35  ;;  %v662_v36 = vld [vmem:[#allocation7 + $0xb8] sm:$0xff]  ;;  %v653_v25 = vld [vmem:[#allocation7 + $0x70] sm:$0xff] }
 0x154   :  { %v1661_v29 = vpack.c.bf16 %v654_v27, %v653_v25  ;;  %v686_v32 = vld [vmem:[#allocation7 + $0x178] sm:$0xff] }
 0x155   :  { %v422_v42 = vrot.slane %v421_v40, 4  ;;  %v434_v45 = vadd.f32 %v433_v41, %v431_v38  ;;  %v1643_v38 = vpack.c.bf16 %v662_v36, %v661_v34  ;;  %v646_v41 = vld [vmem:[#allocation7 + $0x38] sm:$0xff] }
 0x157   :  { %v423_v47 = vadd.f32 %v422_v42, %v421_v40  ;;  %v435_v49 = vrot.slane %v434_v45, 4  ;;  %v645_v40 = vld [vmem:[#allocation7 + $0x30] sm:$0xff] }
 0x158   :  { %v677_v42 = vld [vmem:[#allocation7 + $0x130] sm:$0xff] }
 0x159   :  { %v424_v50 = vrot.slane %v423_v47, 2  ;;  %v436_v52 = vadd.f32 %v435_v49, %v434_v45  ;;  %v1645_v45 = vpack.c.bf16 %v646_v41, %v645_v40 }
 0x15b   :  { %v425_v53 = vadd.f32 %v424_v50, %v423_v47  ;;  %v437_v55 = vrot.slane %v436_v52, 2  ;;  %v678_v47 = vld [vmem:[#allocation7 + $0x138] sm:$0xff]  ;;  %v663_v50 = vld [vmem:[#allocation7 + $0xc0] sm:$0xff] }
 0x15c   :  { %v1675_v49 = vpack.c.bf16 %v678_v47, %v677_v42 }
 0x15d   :  { %v426_v56 = vrot.slane %v425_v53, 1  ;;  %v438_v58 = vadd.f32 %v437_v55, %v436_v52  ;;  %v664_v52 = vld [vmem:[#allocation7 + $0xc8] sm:$0xff]  ;;  %v647_v55 = vld [vmem:[#allocation7 + $0x40] sm:$0xff] }
 0x15f   :  { %v427_v59 = vadd.f32 %v426_v56, %v425_v53  ;;  %v439_v61 = vrot.slane %v438_v58, 1  ;;  %v1647_v53 = vpack.c.bf16 %v664_v52, %v663_v50  ;;  %v648_v56 = vld [vmem:[#allocation7 + $0x48] sm:$0xff]  ;;  %v2146_v50 = vld [vmem:[%s2273_s5] sm:$0x1]  ;;  %v2149_v52 = vsub.s32 0, %v2004_v46 }
 0x161   :  { %1374 = vmatmul.mubr.f32.vlgmr.msra.gmra.mrb[8].mxu0 %v427_v59  ;;  %v440_v62 = vadd.f32 %v439_v61, %v438_v58  ;;  %v679_v58 = vld [vmem:[#allocation7 + $0x140] sm:$0xff]  ;;  %v1649_v59 = vpack.c.bf16 %v648_v56, %v647_v55  ;;  %v680_v61 = vld [vmem:[#allocation7 + $0x148] sm:$0xff] }
 0x162   :  { %1634 = vmatpush3.bf16.msra.mxu0 %v1633_v8  ;;  %v1653_v8 = vpack.c.bf16 %v650_v6, %v649_v5  ;;  %v2155_v56 = vld [vmem:[%s2274_s6] sm:$0x1] }
 0x163   :  { %1409 = vmatmul.mubr.f32.vlgmr.msra.gmra.mrb[4].mxu1 %v440_v62  ;;  %1636 = vmatprep.subr.bf16.mxu0 %v1635_v13  ;;  %v1679_v62 = vpack.c.bf16 %v680_v61, %v679_v58 }
 0x164   :  { %1666 = vmatpush3.bf16.msra.mxu1 %v1663_v10  ;;  %v667_v10 = vld [vmem:[#allocation7 + $0xe0] sm:$0xff] }
 0x165   :  { %1668 = vmatprep.subr.bf16.mxu1 %v1667_v21  ;;  %v1655_v13 = vpack.c.bf16 %v668_v11, %v667_v10 }
 0x166   :  { %1638 = vmatpush3.bf16.msra.mxu0 %v1637_v18  ;;  %v1657_v18 = vpack.c.bf16 %v652_v16, %v651_v15 }
 0x167   :  { %1640 = vmatprep.subr.bf16.mxu0 %v1639_v24 }
 0x168   :  { %1670 = vmatpush3.bf16.msra.mxu1 %v1667_v21  ;;  %v669_v21 = vld [vmem:[#allocation7 + $0xf0] sm:$0xff] }
 0x169   :  { %1672 = vmatprep.subr.bf16.mxu1 %v1671_v33  ;;  %v1659_v24 = vpack.c.bf16 %v670_v22, %v669_v21 }
 0x16a   :  { %1642 = vmatpush3.bf16.msra.mxu0 %v1641_v31  ;;  %v685_v31 = vld [vmem:[#allocation7 + $0x170] sm:$0xff] }
 0x16b   :  { %1644 = vmatprep.subr.bf16.mxu0 %v1643_v38 }
 0x16c   :  { %1674 = vmatpush3.bf16.msra.mxu1 %v1671_v33  ;;  %v1691_v33 = vpack.c.bf16 %v686_v32, %v685_v31 }
 0x16d   :  { %1676 = vmatprep.subr.bf16.mxu1 %v1675_v49 }
 0x16e   :  { %1646 = vmatpush3.bf16.msra.mxu0 %v1645_v45 }
 0x16f   :  { %1648 = vmatprep.subr.bf16.mxu0 %v1647_v53 }
 0x170   :  { %1678 = vmatpush3.bf16.msra.mxu1 %v1675_v49 }
 0x171   :  { %1680 = vmatprep.subr.bf16.mxu1 %v1679_v62 }
 0x172   :  { %1650 = vmatpush3.bf16.msra.mxu0 %v1649_v59 }
 0x173   :  { %1652 = vmatprep.subr.bf16.mxu0 %v1651_v4 }
 0x174   :  { %1682 = vmatpush3.bf16.msra.mxu1 %v1679_v62 }
 0x175   :  { %1684 = vmatprep.subr.bf16.mxu1 %v1683_v12 }
 0x176   :  { %1654 = vmatpush3.bf16.msra.mxu0 %v1653_v8 }
 0x177   :  { %1656 = vmatprep.subr.bf16.mxu0 %v1655_v13 }
 0x178   :  { %1686 = vmatpush3.bf16.msra.mxu1 %v1683_v12 }
 0x179   :  { %1688 = vmatprep.subr.bf16.mxu1 %v1687_v23 }
 0x17a   :  { %1658 = vmatpush3.bf16.msra.mxu0 %v1657_v18 }
 0x17b   :  { %1660 = vmatprep.subr.bf16.mxu0 %v1659_v24 }
 0x17c   :  { %1690 = vmatpush3.bf16.msra.mxu1 %v1687_v23 }
 0x17d   :  { %1692 = vmatprep.subr.bf16.mxu1 %v1691_v33 }
 0x17e   :  { %1662 = vmatpush3.bf16.msra.mxu0 %v1661_v29 }
 0x17f   :  { %1695 = vmatprep.subr.bf16.mxu0 %v1881_v44 }
 0x180   :  { %1694 = vmatpush3.bf16.msra.mxu1 %v1691_v33 }
 0x181   :  { %1719 = vmatprep.subr.bf16.mxu1 %v1881_v44 }
 0x234   :  { %v507_v34 = vpop.f32.mrb[8].mxu0 }
 0x235   :  { %v581_v36 = vmul.f32 0.001953125, %v507_v34  ;;  %v1375_v38 = vpop.f32.mrb[9].mxu0 }
 0x236   :  { %v577_v40 = vpop.f32.mrb[4].mxu1 }
 0x237   :  { %v583_v41 = vmul.f32 %v581_v36, %v581_v36  ;;  %v582_v42 = vmul.f32 0.001953125, %v577_v40  ;;  %v1410_v45 = vpop.f32.mrb[5].mxu1 }
 0x239   :  { %v584_v47 = vsub.f32 %v582_v42, %v583_v41 }
 0x23b   :  { %v585_v49 = vadd.f32 1e-05, %v584_v47 }
 0x23d   :  { %1753 = vrsqrt.f32 %v585_v49 }
 0x247   :  { %v1754_v53 = vpop.eup %1753 }
 0x248   :  { %v587_v55 = vmul.f32 %v1754_v53, %v2146_v50 }
 0x24a   :  { %v588_v58 = vmul.f32 %v587_v55, %v581_v36  ;;  %v594_v59 = vrot.slane %v587_v55, %v2149_v52 }
 0x24c   :  { %v589_v61 = vsub.f32 %v2155_v56, %v588_v58  ;;  %v596_v62 = vmul.f32 %v594_v59, %v2121_v14  ;;  %v599_v1 = vmul.f32 %v594_v59, %v2135_v35  ;;  %v597_v4 = vmul.f32 %v594_v59, %v2123_v20 }
 0x24d   :  { %v598_v5 = vmul.f32 %v594_v59, %v2127_v28 }
 0x24e   :  { %v604_v0 = vrot.slane %v589_v61, %v2149_v52 }
 0x250   :  { %v606_v6 = vadd.f32 %v604_v0, %v596_v62  ;;  %v609_v7 = vadd.f32 %v604_v0, %v599_v1  ;;  %v607_v8 = vadd.f32 %v604_v0, %v597_v4  ;;  %v608_v9 = vadd.f32 %v604_v0, %v598_v5 }
 0x252   :  { %v2164_v10 = vmax.f32 %v606_v6, 0.0  ;;  %v2166_v11 = vmax.f32 %v609_v7, 0.0  ;;  %v2168_v12 = vmax.f32 %v607_v8, 0.0  ;;  %v2170_v13 = vmax.f32 %v608_v9, 0.0 }
 0x254   :  { %757 = vmatprep.mubr.f32.mxu0 %v2164_v10  ;;  %v615_v14 = vrot.slane %v2164_v10, 7  ;;  %v618_v20 = vrot.slane %v2166_v11, 7  ;;  %v627_v28 = vrot.slane %v2164_v10, 1  ;;  %v628_v35 = vrot.slane %v2168_v12, 1 }
 0x255   :  { %v629_v15 = vrot.slane %v2170_v13, 1  ;;  %v630_v16 = vrot.slane %v2166_v11, 1  ;;  %v616_v19 = vrot.slane %v2168_v12, 7  ;;  %v617_v26 = vrot.slane %v2170_v13, 7 }
 0x256   :  { %v622_v17 = vsel %vm169_vm1, %v618_v20, %v615_v14  ;;  %v633_v18 = vsel %vm186_vm0, %v627_v28, %v628_v35 }
 0x257   :  { %1096 = vmatmul.mubr.msk.f32.vlgmr.msra.gmra.mrb[10].mxu0 %vm2025_vm2, %v622_v17  ;;  %1443 = vmatprep.mubr.f32.mxu1 %v633_v18  ;;  %v632_v21 = vsel %vm186_vm0, %v628_v35, %v629_v15  ;;  %v631_v22 = vsel %vm186_vm0, %v629_v15, %v630_v16  ;;  %v621_v23 = vsel %vm169_vm1, %v615_v14, %v616_v19 }
 0x258   :  { %762 = vmatprep.mubr.f32.mxu0 %v2168_v12  ;;  %1444 = vmatmul.mubr.msk.f32.vlgmr.msra.gmra.mrb[6].mxu1 %vm2033_vm3, %v632_v21  ;;  %v634_v30 = vsel %vm186_vm0, %v630_v16, %v627_v28  ;;  %v619_v37 = vsel %vm169_vm1, %v617_v26, %v618_v20 }
 0x259   :  { %1446 = vmatprep.mubr.f32.mxu1 %v631_v22  ;;  %1697 = vmatpush3.bf16.msra.mxu0 %v2066_v43 }
 0x25a   :  { %1721 = vmatpush3.bf16.msra.mxu1 %v2066_v43  ;;  %1698 = vmatprep.subr.bf16.mxu0 %v1881_v44  ;;  %v620_v43 = vsel %vm169_vm1, %v616_v19, %v617_v26 }
 0x25b   :  { %763 = vmatmul.mubr.f32.gmra.mrb[12].mxu0 %v621_v23  ;;  %1722 = vmatprep.subr.bf16.mxu1 %v1881_v44 }
 0x25c   :  { %767 = vmatprep.mubr.f32.mxu0 %v2170_v13  ;;  %1447 = vmatmul.mubr.msk.f32.gmra.mrb[8].mxu1 %vm2050_vm4, %v634_v30 }
 0x25d   :  { %1700 = vmatpush3.bf16.msra.mxu0 %v2074_v48  ;;  %1516 = vmatprep.mubr.msk.f32.mxu1 %vm1882_vm6, %v1883_v3 }
 0x25e   :  { %1724 = vmatpush3.bf16.msra.mxu1 %v2074_v48  ;;  %1701 = vmatprep.subr.bf16.mxu0 %v1881_v44 }
 0x25f   :  { %1098 = vmatmul.mubr.msk.f32.gmra.mrb[14].mxu0 %vm2056_vm5, %v620_v43  ;;  %1725 = vmatprep.subr.bf16.mxu1 %v1881_v44 }
 0x260   :  { %772 = vmatprep.mubr.f32.mxu0 %v2166_v11 }
 0x261   :  { %1703 = vmatpush3.bf16.msra.mxu0 %v2080_v51 }
 0x262   :  { %1727 = vmatpush3.bf16.msra.mxu1 %v2080_v51  ;;  %1704 = vmatprep.subr.bf16.mxu0 %v1881_v44  ;;  %v1094_v51 = vld [vmem:[%s2272_s4] ss:$0 sm:$0xff]  ;;  %s1884_s4 = smov [#allocation10]  }
 0x263   :  { %773 = vmatmul.mubr.f32.gmra.mrb[16].mxu0 %v619_v37  ;;  %1728 = vmatprep.subr.bf16.mxu1 %v1881_v44  ;;  %s1071_s14 = sshll.u32 %s1884_s4, 4  ;;  %s1072_s14 = int_to_ptr.vmem [resolvable:$true] %s1071_s14 }
 0x264   :  { %1481 = vmatprep.mubr.msk.f32.mxu0 %vm1882_vm6, %v1883_v3  ;;  %s1845_s15 = scalar_lea.vmem %s1072_s14, 512  ;;  %p1850_p5 = scmp.lt.s32.totalorder %s1072_s14, %s1072_s14 }
 0x265   :  { %1706 = vmatpush3.bf16.msra.mxu0 %v2086_v54  ;;  %p1846_p4 = scmp.ne.s32.totalorder %s1072_s14, %s1845_s15  ;;  %p1851_p6 = scmp.lt.s32.totalorder %s1845_s15, %s1845_s15 }
 0x266   :  { %1730 = vmatpush3.bf16.msra.mxu1 %v2086_v54  ;;  %1707 = vmatprep.subr.bf16.mxu0 %v1881_v44 }
 0x267   :  { %1731 = vmatprep.subr.bf16.mxu1 %v1881_v44  ;;  %p1852_p7 = por %p1851_p6, %p1850_p5 }
 0x269   :  { %1709 = vmatpush3.bf16.msra.mxu0 %v2092_v57  ;;  %p1853_p8 = pnand %p1852_p7, %p1846_p4 }
 0x26a   :  { %1733 = vmatpush3.bf16.msra.mxu1 %v2092_v57  ;;  %1710 = vmatprep.subr.bf16.mxu0 %v1881_v44 }
 0x26b   :  { %1734 = vmatprep.subr.bf16.mxu1 %v1881_v44 }
 0x26d   :  { %1712 = vmatpush3.bf16.msra.mxu0 %v2098_v60 }
 0x26e   :  { %1736 = vmatpush3.bf16.msra.mxu1 %v2098_v60  ;;  %1713 = vmatprep.subr.bf16.mxu0 %v1881_v44 }
 0x26f   :  { %1737 = vmatprep.subr.bf16.mxu1 %v1881_v44 }
 0x271   :  { %1715 = vmatpush3.bf16.msra.mxu0 %v2104_v63 }
 0x272   :  { %1739 = vmatpush3.bf16.msra.mxu1 %v2104_v63  ;;  %1716 = vmatprep.subr.bf16.mxu0 %v1881_v44 }
 0x273   :  { %1740 = vmatprep.subr.bf16.mxu1 %v1881_v44 }
 0x275   :  { %1718 = vmatpush3.bf16.msra.mxu0 %v2110_v2 }
 0x276   :  { %1742 = vmatpush3.bf16.msra.mxu1 %v2110_v2 }
 0x32a   :  { %v1237_v46 = vpop.f32.mrb[10].mxu0 }
 0x32b   :  { %v1238_v39 = vpop.f32.mrb[11].mxu0  ;;  %v1445_v48 = vpop.f32.mrb[6].mxu1 }
 0x32c   :  { %v1239_v54 = vadd.f32 %v1238_v39, %v1237_v46  ;;  %v844_v57 = vpop.f32.mrb[7].mxu1 }
 0x32e   :  { %v760_v60 = vadd.f32 %v1239_v54, %v1094_v51  ;;  %v1240_v3 = vpop.f32.mrb[12].mxu0 }
 0x32f   :  { %v1241_v63 = vpop.f32.mrb[13].mxu0  ;;  %v1448_v24 = vpop.f32.mrb[8].mxu1 }
 0x330   :  { %v845_v25 = vadd.f32 %v844_v57, %v760_v60  ;;  %v1242_v27 = vadd.f32 %v1241_v63, %v1240_v3  ;;  %v854_v44 = vpop.f32.mrb[9].mxu1 }
 0x332   :  { %v765_v29 = vadd.f32 %v1242_v27, %v1094_v51  ;;  %v1243_v31 = vpop.f32.mrb[14].mxu0  ;;  %v872_v45 = vmul.f32 %v845_v25, %v845_v25 }
 0x333   :  { %v1244_v32 = vpop.f32.mrb[15].mxu0 }
 0x334   :  { %v850_v2 = vadd.f32 %v1445_v48, %v765_v29  ;;  %v1245_v33 = vadd.f32 %v1244_v32, %v1243_v31 }
 0x336   :  { %v770_v34 = vadd.f32 %v1245_v33, %v1094_v51  ;;  %v1246_v36 = vpop.f32.mrb[16].mxu0  ;;  %v873_v40 = vmul.f32 %v850_v2, %v850_v2  ;;  %v863_v47 = vadd.f32 %v850_v2, %v845_v25 }
 0x337   :  { %v1247_v38 = vpop.f32.mrb[17].mxu0 }
 0x338   :  { %v855_v41 = vadd.f32 %v854_v44, %v770_v34  ;;  %v1248_v42 = vadd.f32 %v1247_v38, %v1246_v36  ;;  %v876_v55 = vadd.f32 %v873_v40, %v872_v45 }
 0x33a   :  { %v874_v49 = vmul.f32 %v855_v41, %v855_v41  ;;  %v775_v53 = vadd.f32 %v1248_v42, %v1094_v51  ;;  %v864_v58 = vadd.f32 %v863_v47, %v855_v41 }
 0x33c   :  { %v860_v59 = vadd.f32 %v1448_v24, %v775_v53  ;;  %v877_v61 = vadd.f32 %v876_v55, %v874_v49 }
 0x33e   :  { %v865_v62 = vadd.f32 %v864_v58, %v860_v59  ;;  %v875_v0 = vmul.f32 %v860_v59, %v860_v59 }
 0x340   :  { %v866_v1 = vrot.slane %v865_v62, 4  ;;  %v878_v4 = vadd.f32 %v877_v61, %v875_v0 }
 0x342   :  { %v867_v5 = vadd.f32 %v866_v1, %v865_v62  ;;  %v879_v6 = vrot.slane %v878_v4, 4 }
 0x344   :  { %v868_v7 = vrot.slane %v867_v5, 2  ;;  %v880_v8 = vadd.f32 %v879_v6, %v878_v4 }
 0x346   :  { %v869_v9 = vadd.f32 %v868_v7, %v867_v5  ;;  %v881_v14 = vrot.slane %v880_v8, 2 }
 0x348   :  { %v870_v20 = vrot.slane %v869_v9, 1  ;;  %v882_v28 = vadd.f32 %v881_v14, %v880_v8 }
 0x34a   :  { %v871_v35 = vadd.f32 %v870_v20, %v869_v9  ;;  %v883_v15 = vrot.slane %v882_v28, 1 }
 0x34c   :  { %1482 = vmatmul.mubr.f32.vlgmr.msra.gmra.mrb[18].mxu0 %v871_v35  ;;  %v884_v16 = vadd.f32 %v883_v15, %v882_v28 }
 0x34e   :  { %1517 = vmatmul.mubr.f32.vlgmr.msra.gmra.mrb[10].mxu1 %v884_v16 }
 0x41f   :  { %v951_v17 = vpop.f32.mrb[18].mxu0 }
 0x420   :  { %v1025_v18 = vmul.f32 0.001953125, %v951_v17  ;;  %v1483_v19 = vpop.f32.mrb[19].mxu0 }
 0x421   :  { %v1021_v21 = vpop.f32.mrb[10].mxu1 }
 0x422   :  { %v1027_v22 = vmul.f32 %v1025_v18, %v1025_v18  ;;  %v1026_v23 = vmul.f32 0.001953125, %v1021_v21  ;;  %v1518_v26 = vpop.f32.mrb[11].mxu1 }
 0x424   :  { %v1028_v30 = vsub.f32 %v1026_v23, %v1027_v22 }
 0x426   :  { %v1029_v43 = vadd.f32 1e-05, %v1028_v30 }
 0x428   :  { %1755 = vrsqrt.f32 %v1029_v43 }
 0x432   :  { %v1756_v37 = vpop.eup %1755 }
 0x433   :  { %v1031_v46 = vmul.f32 %v1756_v37, %v2146_v50 }
 0x435   :  { %v1032_v39 = vmul.f32 %v1031_v46, %v1025_v18  ;;  %v1038_v48 = vrot.slane %v1031_v46, %v2149_v52 }
 0x437   :  { %v1033_v51 = vsub.f32 %v2155_v56, %v1032_v39  ;;  %v1040_v54 = vmul.f32 %v1038_v48, %v845_v25  ;;  %v1041_v57 = vmul.f32 %v1038_v48, %v850_v2  ;;  %v1042_v60 = vmul.f32 %v1038_v48, %v855_v41 }
 0x438   :  { %v1043_v3 = vmul.f32 %v1038_v48, %v860_v59 }
 0x439   :  { %v1044_v63 = vadd.f32 %v1040_v54, %v2164_v10  ;;  %v1045_v24 = vadd.f32 %v1041_v57, %v2168_v12  ;;  %v1046_v27 = vadd.f32 %v1042_v60, %v2170_v13  ;;  %v1052_v44 = vrot.slane %v1033_v51, %v2149_v52 }
 0x43a   :  { %v1047_v29 = vadd.f32 %v1043_v3, %v2166_v11 }
 0x43b   :  { %v1054_v50 = vadd.f32 %v1052_v44, %v1044_v63  ;;  %v1055_v31 = vadd.f32 %v1052_v44, %v1045_v24  ;;  %v1056_v32 = vadd.f32 %v1052_v44, %v1046_v27 }
 0x43c   :  { %v1057_v56 = vadd.f32 %v1052_v44, %v1047_v29 }
 0x43d   :  { %v1058_v25 = vmax.f32 %v1054_v50, 0.0  ;;  %v1059_v2 = vmax.f32 %v1055_v31, 0.0  ;;  %v1060_v33 = vmax.f32 %v1056_v32, 0.0 }
 0x43e   :  { %v1061_v34 = vmax.f32 %v1057_v56, 0.0 }
 0x43f   :  { %1062 = vst [vmem:[#allocation10] sm:$0xff] %v1058_v25  ;;  %1063 = vst [vmem:[#allocation10 + $0x8] sm:$0xff] %v1059_v2 }
 0x440   :  { %1064 = vst [vmem:[#allocation10 + $0x10] sm:$0xff] %v1060_v33  ;;  %1065 = vst [vmem:[#allocation10 + $0x18] sm:$0xff] %v1061_v34 }
 0x441   :  { %1856 = shalt.err (!%p1853_p8)
}
 0x442   :  { %s1857_s20 = scalar_lea.hbm %s2276_s8, 512 }
 0x443   :  { %p1858_p9 = scmp.ne.s32.totalorder %s2276_s8, %s1857_s20  ;;  %p1861_p10 = scmp.lt.u32.totalorder %s1857_s20, %s2276_s8 }
 0x445   :  { %p1863_p11 = pnand %p1861_p10, %p1858_p9 }
 0x447   :  { %1866 = shalt.err (!%p1863_p11)
}
 0x448   :  { %1077 = dma.vmem_to_hbm [thread:$0]  %s1072_s14, 512, %s2276_s8, [#allocation4], %s1877_s17, %s1877_s17, %s1878_s18  }
 0x449   :  { %1873 = dma.done.wait [#allocation4], 512  }
 0x44a   :  { %1874 = vsyncadd [#allocation4], 4294966784 }
 0x44b   :  { %1081 = vsyncpa [#allocation3], 1 }
 0x44c   :  { %1082 = vsyncpa [#allocation6], 1 }
 0x44d   :  { %1083 = vsyncpa [#allocation9], 1 }
 0x44e   :  { %1084 = vsyncpa [#allocation4], 1 }

</bundles_post_ra>
